<compile_context>
chip_gen: v6e
topology: v6e:2x2x1
jax: 0.10.0
libtpu: 0.0.40
codegen_flags: <defaults>
</compile_context>

<pallas_src>
import jax
import jax.numpy as jnp
from jax.experimental import pallas as pl
from jax.experimental.pallas import tpu as pltpu

NUM_STATES = 4
NUM_ACTIONS = 2
NUM_ATOMS = 51
VMIN, VMAX = -10, 10
HIDDEN1 = 32
HIDDEN2 = 64
OUT_DIM = NUM_ACTIONS * NUM_ATOMS  # 102


def rainbow_kernel(x_ref,
                   w1_ref, b1_ref,
                   w2_ref, b2_ref,
                   wva_ref, bva_ref,
                   wq_ref, bq_ref,
                   out_ref):
    # ---- trunk: linear1 -> relu -> linear2 -> relu ----
    x = x_ref[...]                                                         # (TB, 4)
    h = jnp.dot(x, w1_ref[...], preferred_element_type=jnp.float32) + b1_ref[...]
    h = jnp.maximum(h, 0.0)                                                # (TB, 32)
    h = jnp.dot(h, w2_ref[...], preferred_element_type=jnp.float32) + b2_ref[...]
    h = jnp.maximum(h, 0.0)                                                # (TB, 64)

    # ---- fused first noisy stage: one (64, 128) matmul -> [value_h | advantage_h] ----
    va = jnp.dot(h, wva_ref[...], preferred_element_type=jnp.float32) + bva_ref[...]
    va = jnp.maximum(va, 0.0)                                              # (TB, 128)

    # ---- fused second noisy stage + dueling combine (all linear): one (128, 102) matmul
    #      directly producing pre-softmax logits [q(a=0, atoms) | q(a=1, atoms)] ----
    q = jnp.dot(va, wq_ref[...], preferred_element_type=jnp.float32) + bq_ref[...]  # (TB, 102)

    # ---- segmented softmax over atoms (two 51-lane segments in one vreg set) ----
    q0 = q[:, :NUM_ATOMS]
    q1 = q[:, NUM_ATOMS:]
    lane = jax.lax.broadcasted_iota(jnp.int32, q.shape, 1)
    seg0 = lane < NUM_ATOMS
    m = jnp.where(seg0,
                  jnp.max(q0, axis=-1, keepdims=True),
                  jnp.max(q1, axis=-1, keepdims=True))                     # (TB, 102)
    e = jnp.exp(q - m)
    s = jnp.where(seg0,
                  jnp.sum(e[:, :NUM_ATOMS], axis=-1, keepdims=True),
                  jnp.sum(e[:, NUM_ATOMS:], axis=-1, keepdims=True))       # (TB, 102)
    # single contiguous lane-dense store of both actions' distributions
    out_ref[...] = e * pl.reciprocal(s, approx=False)


def rainbow_forward(x, kparams, *, tile_b=512):
    """x: (B, num_states) f32 -> (B, num_actions, num_atoms) f32 distributions."""
    B = x.shape[0]
    tb = min(B, tile_b)
    pad = (-B) % tb
    if pad:
        x = jnp.pad(x, ((0, pad), (0, 0)))
    Bp = B + pad
    grid = (Bp // tb,)

    # weights: whole-array, resident in VMEM across all grid steps
    resident = pl.BlockSpec(memory_space=pltpu.MemorySpace.VMEM)
    in_specs = [pl.BlockSpec((tb, NUM_STATES), lambda i: (i, 0))] + [resident] * len(kparams)
    out_specs = pl.BlockSpec((tb, OUT_DIM), lambda i: (i, 0))

    n_weight_elems = sum(int(p.size) for p in kparams)
    cost = pl.CostEstimate(
        flops=2 * Bp * (NUM_STATES * HIDDEN1 + HIDDEN1 * HIDDEN2
                        + HIDDEN2 * 2 * HIDDEN2 + 2 * HIDDEN2 * OUT_DIM),
        transcendentals=Bp * OUT_DIM,
        bytes_accessed=4 * (Bp * (NUM_STATES + OUT_DIM) + n_weight_elems),
    )

    out = pl.pallas_call(
        rainbow_kernel,
        out_shape=jax.ShapeDtypeStruct((Bp, OUT_DIM), jnp.float32),
        grid=grid,
        in_specs=in_specs,
        out_specs=out_specs,
        compiler_params=pltpu.CompilerParams(
            dimension_semantics=("parallel",)),   # shard batch tiles across TCs on v7x
        cost_estimate=cost,
    )(x, *kparams)

    # (B, 102) -> (B, 2, 51) is a free row-major view; matches PyTorch .view order.
    return out[:B].reshape(B, NUM_ACTIONS, NUM_ATOMS)


def make_params(key):
    """Deterministic synthetic parameters (raw / unfused). NoisyLinear layers are
    realized as effective weights = mu + sigma * epsilon with epsilon fixed here."""
    keys = jax.random.split(key, 24)   # 2 dense layers * 2 keys + 4 noisy layers * 4 keys = 20 used
    k = iter(keys)

    def dense(fan_in, fan_out):
        w = jax.random.normal(next(k), (fan_in, fan_out), jnp.float32) * 0.1
        b = jax.random.normal(next(k), (1, fan_out), jnp.float32) * 0.1
        return w, b

    def noisy(fan_in, fan_out, std_init=0.4):
        w_mu = jax.random.normal(next(k), (fan_in, fan_out), jnp.float32) * 0.1
        b_mu = jax.random.normal(next(k), (1, fan_out), jnp.float32) * 0.1
        w_eps = jax.random.normal(next(k), (fan_in, fan_out), jnp.float32)
        b_eps = jax.random.normal(next(k), (1, fan_out), jnp.float32)
        sigma = std_init / jnp.sqrt(jnp.float32(fan_in))
        return w_mu + sigma * w_eps, b_mu + sigma * b_eps

    w1, b1 = dense(NUM_STATES, HIDDEN1)
    w2, b2 = dense(HIDDEN1, HIDDEN2)
    wv1, bv1 = noisy(HIDDEN2, HIDDEN2)
    wv2, bv2 = noisy(HIDDEN2, NUM_ATOMS)
    wa1, ba1 = noisy(HIDDEN2, HIDDEN2)
    wa2, ba2 = noisy(HIDDEN2, NUM_ATOMS * NUM_ACTIONS)   # columns = [action0 atoms | action1 atoms]
    return (w1, b1, w2, b2, wv1, bv1, wv2, bv2, wa1, ba1, wa2, ba2)


def fuse_params(raw):
    """Fold value/advantage streams and the (linear) dueling combine into two fused weights."""
    (w1, b1, w2, b2, wv1, bv1, wv2, bv2, wa1, ba1, wa2, ba2) = raw
    # first noisy stage: [v | a] = relu(h @ [wv1 | wa1] + [bv1 | ba1])
    w_va = jnp.concatenate([wv1, wa1], axis=1)          # (64, 128)
    b_va = jnp.concatenate([bv1, ba1], axis=1)          # (1, 128)
    # second stage + dueling combine:
    #   q_a = value + adv_a - 0.5*(adv_0 + adv_1) = v@wv2 + a@(0.5*(wa2_a - wa2_other)) + ...
    wa2_0, wa2_1 = wa2[:, :NUM_ATOMS], wa2[:, NUM_ATOMS:]
    ba2_0, ba2_1 = ba2[:, :NUM_ATOMS], ba2[:, NUM_ATOMS:]
    wq0 = jnp.concatenate([wv2, 0.5 * (wa2_0 - wa2_1)], axis=0)   # (128, 51)
    wq1 = jnp.concatenate([wv2, 0.5 * (wa2_1 - wa2_0)], axis=0)   # (128, 51)
    w_q = jnp.concatenate([wq0, wq1], axis=1)                     # (128, 102)
    b_q = jnp.concatenate([bv2 + 0.5 * (ba2_0 - ba2_1),
                           bv2 + 0.5 * (ba2_1 - ba2_0)], axis=1)  # (1, 102)
    return (w1, b1, w2, b2, w_va, b_va, w_q, b_q)


def reference_forward(x, raw):
    """Pure-JAX reference mirroring the PyTorch module (unfused)."""
    (w1, b1, w2, b2, wv1, bv1, wv2, bv2, wa1, ba1, wa2, ba2) = raw
    B = x.shape[0]
    h = jax.nn.relu(x @ w1 + b1)
    h = jax.nn.relu(h @ w2 + b2)
    v = jax.nn.relu(h @ wv1 + bv1)
    value = v @ wv2 + bv2                                          # (B, 51)
    a = jax.nn.relu(h @ wa1 + ba1)
    adv = (a @ wa2 + ba2).reshape(B, NUM_ACTIONS, NUM_ATOMS)       # (B, 2, 51)
    q = value[:, None, :] + adv - adv.mean(axis=1, keepdims=True)
    return jax.nn.softmax(q, axis=-1)


if __name__ == "__main__":
    key = jax.random.PRNGKey(0)
    pkey, xkey = jax.random.split(key)
    raw = make_params(pkey)
    kparams = fuse_params(raw)

    # TODO(synk): NoisyLinear.reset_noise()/act() are host-side (noise resampling /
    # epsilon-greedy) and are not part of the kernel; noise is folded into weights above.

    # small batch: single grid step
    B = 8
    x = jax.random.normal(xkey, (B, NUM_STATES), jnp.float32)
    out = jax.block_until_ready(rainbow_forward(x, kparams))
    ref = reference_forward(x, raw)
    assert out.shape == (B, NUM_ACTIONS, NUM_ATOMS)
    # tolerance covers MXU default-precision matmuls vs the XLA f32 reference
    assert jnp.allclose(out, ref, atol=1e-4, rtol=1e-4), "mismatch vs JAX reference (B=8)"
    # each row is a probability distribution over atoms
    assert jnp.allclose(out.sum(-1), jnp.ones((B, NUM_ACTIONS)), atol=1e-5)

    # larger batch: exercises the batch grid (2 tiles) + parallel dimension semantics
    B2 = 256
    x2 = jax.random.normal(jax.random.PRNGKey(1), (B2, NUM_STATES), jnp.float32)
    out2 = jax.block_until_ready(rainbow_forward(x2, kparams, tile_b=128))
    ref2 = reference_forward(x2, raw)
    assert out2.shape == (B2, NUM_ACTIONS, NUM_ATOMS)
    assert jnp.allclose(out2, ref2, atol=1e-4, rtol=1e-4), "mismatch vs JAX reference (B=256)"

    print("KERNEL_OK")
</pallas_src>

<mosaic_0001>
module attributes {stable_mosaic.version = 11 : i64} {
  func.func @rainbow_kernel(%arg0: i32, %arg1: memref<8x4xf32, #tpu.memory_space<vmem>>, %arg2: memref<4x32xf32, #tpu.memory_space<vmem>>, %arg3: memref<1x32xf32, #tpu.memory_space<vmem>>, %arg4: memref<32x64xf32, #tpu.memory_space<vmem>>, %arg5: memref<1x64xf32, #tpu.memory_space<vmem>>, %arg6: memref<64x128xf32, #tpu.memory_space<vmem>>, %arg7: memref<1x128xf32, #tpu.memory_space<vmem>>, %arg8: memref<128x102xf32, #tpu.memory_space<vmem>>, %arg9: memref<1x102xf32, #tpu.memory_space<vmem>>, %arg10: memref<8x102xf32, #tpu.memory_space<vmem>>) attributes {dimension_semantics = [#tpu.dimension_semantics<parallel>], iteration_bounds = array<i64: 1>, scalar_prefetch = 0 : i64, scratch_operands = 0 : i64, tpu.core_type = #tpu.core_type<tc>, window_params = [{transform_indices = @transform_0, window_bounds = array<i64: 8, 4>}, {pipeline_mode = #tpu.pipeline_mode<synchronous>, transform_indices = @transform_1, window_bounds = array<i64: 4, 32>}, {pipeline_mode = #tpu.pipeline_mode<synchronous>, transform_indices = @transform_2, window_bounds = array<i64: 1, 32>}, {pipeline_mode = #tpu.pipeline_mode<synchronous>, transform_indices = @transform_3, window_bounds = array<i64: 32, 64>}, {pipeline_mode = #tpu.pipeline_mode<synchronous>, transform_indices = @transform_4, window_bounds = array<i64: 1, 64>}, {pipeline_mode = #tpu.pipeline_mode<synchronous>, transform_indices = @transform_5, window_bounds = array<i64: 64, 128>}, {pipeline_mode = #tpu.pipeline_mode<synchronous>, transform_indices = @transform_6, window_bounds = array<i64: 1, 128>}, {pipeline_mode = #tpu.pipeline_mode<synchronous>, transform_indices = @transform_7, window_bounds = array<i64: 128, 102>}, {pipeline_mode = #tpu.pipeline_mode<synchronous>, transform_indices = @transform_8, window_bounds = array<i64: 1, 102>}, {transform_indices = @transform_9, window_bounds = array<i64: 8, 102>}]} {
    %c0 = arith.constant 0 : index
    %c0_0 = arith.constant 0 : index
    %0 = vector.load %arg1[%c0, %c0_0] : memref<8x4xf32, #tpu.memory_space<vmem>>, vector<8x4xf32>
    %c0_1 = arith.constant 0 : index
    %c0_2 = arith.constant 0 : index
    %1 = vector.load %arg2[%c0_1, %c0_2] : memref<4x32xf32, #tpu.memory_space<vmem>>, vector<4x32xf32>
    %cst = arith.constant dense<0.000000e+00> : vector<8x32xf32>
    %2 = tpu.matmul %0, %1, %cst {dimension_numbers = #tpu.dot_dimension_numbers<[1], [0], [0], [1], [0, 0, 1, 1], [], []>} : vector<8x4xf32>, vector<4x32xf32>, vector<8x32xf32> -> vector<8x32xf32>
    %c0_3 = arith.constant 0 : index
    %c0_4 = arith.constant 0 : index
    %3 = vector.load %arg3[%c0_3, %c0_4] : memref<1x32xf32, #tpu.memory_space<vmem>>, vector<1x32xf32>
    %4 = vector.broadcast %3 : vector<1x32xf32> to vector<8x32xf32>
    %5 = arith.addf %2, %4 : vector<8x32xf32>
    %cst_5 = arith.constant 0.000000e+00 : f32
    %6 = vector.broadcast %cst_5 : f32 to vector<8x32xf32>
    %7 = arith.maximumf %5, %6 : vector<8x32xf32>
    %c0_6 = arith.constant 0 : index
    %c0_7 = arith.constant 0 : index
    %8 = vector.load %arg4[%c0_6, %c0_7] : memref<32x64xf32, #tpu.memory_space<vmem>>, vector<32x64xf32>
    %cst_8 = arith.constant dense<0.000000e+00> : vector<8x64xf32>
    %9 = tpu.matmul %7, %8, %cst_8 {dimension_numbers = #tpu.dot_dimension_numbers<[1], [0], [0], [1], [0, 0, 1, 1], [], []>} : vector<8x32xf32>, vector<32x64xf32>, vector<8x64xf32> -> vector<8x64xf32>
    %c0_9 = arith.constant 0 : index
    %c0_10 = arith.constant 0 : index
    %10 = vector.load %arg5[%c0_9, %c0_10] : memref<1x64xf32, #tpu.memory_space<vmem>>, vector<1x64xf32>
    %11 = vector.broadcast %10 : vector<1x64xf32> to vector<8x64xf32>
    %12 = arith.addf %9, %11 : vector<8x64xf32>
    %cst_11 = arith.constant 0.000000e+00 : f32
    %13 = vector.broadcast %cst_11 : f32 to vector<8x64xf32>
    %14 = arith.maximumf %12, %13 : vector<8x64xf32>
    %c0_12 = arith.constant 0 : index
    %c0_13 = arith.constant 0 : index
    %15 = vector.load %arg6[%c0_12, %c0_13] : memref<64x128xf32, #tpu.memory_space<vmem>>, vector<64x128xf32>
    %cst_14 = arith.constant dense<0.000000e+00> : vector<8x128xf32>
    %16 = tpu.matmul %14, %15, %cst_14 {dimension_numbers = #tpu.dot_dimension_numbers<[1], [0], [0], [1], [0, 0, 1, 1], [], []>} : vector<8x64xf32>, vector<64x128xf32>, vector<8x128xf32> -> vector<8x128xf32>
    %c0_15 = arith.constant 0 : index
    %c0_16 = arith.constant 0 : index
    %17 = vector.load %arg7[%c0_15, %c0_16] : memref<1x128xf32, #tpu.memory_space<vmem>>, vector<1x128xf32>
    %18 = vector.broadcast %17 : vector<1x128xf32> to vector<8x128xf32>
    %19 = arith.addf %16, %18 : vector<8x128xf32>
    %cst_17 = arith.constant 0.000000e+00 : f32
    %20 = vector.broadcast %cst_17 : f32 to vector<8x128xf32>
    %21 = arith.maximumf %19, %20 : vector<8x128xf32>
    %c0_18 = arith.constant 0 : index
    %c0_19 = arith.constant 0 : index
    %22 = vector.load %arg8[%c0_18, %c0_19] : memref<128x102xf32, #tpu.memory_space<vmem>>, vector<128x102xf32>
    %cst_20 = arith.constant dense<0.000000e+00> : vector<8x102xf32>
    %23 = tpu.matmul %21, %22, %cst_20 {dimension_numbers = #tpu.dot_dimension_numbers<[1], [0], [0], [1], [0, 0, 1, 1], [], []>} : vector<8x128xf32>, vector<128x102xf32>, vector<8x102xf32> -> vector<8x102xf32>
    %c0_21 = arith.constant 0 : index
    %c0_22 = arith.constant 0 : index
    %24 = vector.load %arg9[%c0_21, %c0_22] : memref<1x102xf32, #tpu.memory_space<vmem>>, vector<1x102xf32>
    %25 = vector.broadcast %24 : vector<1x102xf32> to vector<8x102xf32>
    %26 = arith.addf %23, %25 : vector<8x102xf32>
    %27 = vector.extract_strided_slice %26 {offsets = [0, 0], sizes = [8, 51], strides = [1, 1]} : vector<8x102xf32> to vector<8x51xf32>
    %28 = vector.extract_strided_slice %26 {offsets = [0, 51], sizes = [8, 51], strides = [1, 1]} : vector<8x102xf32> to vector<8x51xf32>
    %29 = tpu.iota {dimensions = array<i32: 1>} : vector<8x102xi32>
    %c51_i32 = arith.constant 51 : i32
    %30 = vector.broadcast %c51_i32 : i32 to vector<8x102xi32>
    %31 = arith.cmpi slt, %29, %30 : vector<8x102xi32>
    %cst_23 = arith.constant dense<0xFF800000> : vector<8xf32>
    %32 = vector.multi_reduction <maximumf>, %27, %cst_23 [1] : vector<8x51xf32> to vector<8xf32>
    %33 = vector.shape_cast %32 : vector<8xf32> to vector<8x1xf32>
    %cst_24 = arith.constant dense<0xFF800000> : vector<8xf32>
    %34 = vector.multi_reduction <maximumf>, %28, %cst_24 [1] : vector<8x51xf32> to vector<8xf32>
    %35 = vector.shape_cast %34 : vector<8xf32> to vector<8x1xf32>
    %36 = vector.shape_cast %33 : vector<8x1xf32> to vector<8x1xf32>
    %37 = vector.broadcast %36 : vector<8x1xf32> to vector<8x102xf32>
    %38 = vector.shape_cast %35 : vector<8x1xf32> to vector<8x1xf32>
    %39 = vector.broadcast %38 : vector<8x1xf32> to vector<8x102xf32>
    %40 = arith.select %31, %37, %39 : vector<8x102xi1>, vector<8x102xf32>
    %41 = arith.subf %26, %40 : vector<8x102xf32>
    %42 = math.exp %41 : vector<8x102xf32>
    %43 = vector.extract_strided_slice %42 {offsets = [0, 0], sizes = [8, 51], strides = [1, 1]} : vector<8x102xf32> to vector<8x51xf32>
    %cst_25 = arith.constant dense<0.000000e+00> : vector<8xf32>
    %44 = vector.multi_reduction <add>, %43, %cst_25 [1] : vector<8x51xf32> to vector<8xf32>
    %45 = vector.shape_cast %44 : vector<8xf32> to vector<8x1xf32>
    %46 = vector.extract_strided_slice %42 {offsets = [0, 51], sizes = [8, 51], strides = [1, 1]} : vector<8x102xf32> to vector<8x51xf32>
    %cst_26 = arith.constant dense<0.000000e+00> : vector<8xf32>
    %47 = vector.multi_reduction <add>, %46, %cst_26 [1] : vector<8x51xf32> to vector<8xf32>
    %48 = vector.shape_cast %47 : vector<8xf32> to vector<8x1xf32>
    %49 = vector.shape_cast %45 : vector<8x1xf32> to vector<8x1xf32>
    %50 = vector.broadcast %49 : vector<8x1xf32> to vector<8x102xf32>
    %51 = vector.shape_cast %48 : vector<8x1xf32> to vector<8x1xf32>
    %52 = vector.broadcast %51 : vector<8x1xf32> to vector<8x102xf32>
    %53 = arith.select %31, %50, %52 : vector<8x102xi1>, vector<8x102xf32>
    %54 = tpu.reciprocal %53 : vector<8x102xf32> -> vector<8x102xf32>
    %55 = arith.mulf %42, %54 : vector<8x102xf32>
    %c0_27 = arith.constant 0 : index
    %c0_28 = arith.constant 0 : index
    %56 = vector.load %arg10[%c0_27, %c0_28] : memref<8x102xf32, #tpu.memory_space<vmem>>, vector<8x102xf32>
    tpu.vector_store %arg10[%c0_27, %c0_28], %55 {strides = array<i32>} : memref<8x102xf32, #tpu.memory_space<vmem>>, vector<8x102xf32>,
    return
  }
  func.func @transform_0(%arg0: i32) -> (i32, i32) {
    %c0_i32 = arith.constant 0 : i32
    %c0_i32_0 = arith.constant 0 : i32
    return %arg0, %c0_i32 : i32, i32
  }
  func.func @transform_1(%arg0: i32) -> (i32, i32) {
    %c0_i32 = arith.constant 0 : i32
    %c0_i32_0 = arith.constant 0 : i32
    %c0_i32_1 = arith.constant 0 : i32
    return %c0_i32, %c0_i32_0 : i32, i32
  }
  func.func @transform_2(%arg0: i32) -> (i32, i32) {
    %c0_i32 = arith.constant 0 : i32
    %c0_i32_0 = arith.constant 0 : i32
    %c0_i32_1 = arith.constant 0 : i32
    return %c0_i32, %c0_i32_0 : i32, i32
  }
  func.func @transform_3(%arg0: i32) -> (i32, i32) {
    %c0_i32 = arith.constant 0 : i32
    %c0_i32_0 = arith.constant 0 : i32
    %c0_i32_1 = arith.constant 0 : i32
    return %c0_i32, %c0_i32_0 : i32, i32
  }
  func.func @transform_4(%arg0: i32) -> (i32, i32) {
    %c0_i32 = arith.constant 0 : i32
    %c0_i32_0 = arith.constant 0 : i32
    %c0_i32_1 = arith.constant 0 : i32
    return %c0_i32, %c0_i32_0 : i32, i32
  }
  func.func @transform_5(%arg0: i32) -> (i32, i32) {
    %c0_i32 = arith.constant 0 : i32
    %c0_i32_0 = arith.constant 0 : i32
    %c0_i32_1 = arith.constant 0 : i32
    return %c0_i32, %c0_i32_0 : i32, i32
  }
  func.func @transform_6(%arg0: i32) -> (i32, i32) {
    %c0_i32 = arith.constant 0 : i32
    %c0_i32_0 = arith.constant 0 : i32
    %c0_i32_1 = arith.constant 0 : i32
    return %c0_i32, %c0_i32_0 : i32, i32
  }
  func.func @transform_7(%arg0: i32) -> (i32, i32) {
    %c0_i32 = arith.constant 0 : i32
    %c0_i32_0 = arith.constant 0 : i32
    %c0_i32_1 = arith.constant 0 : i32
    return %c0_i32, %c0_i32_0 : i32, i32
  }
  func.func @transform_8(%arg0: i32) -> (i32, i32) {
    %c0_i32 = arith.constant 0 : i32
    %c0_i32_0 = arith.constant 0 : i32
    %c0_i32_1 = arith.constant 0 : i32
    return %c0_i32, %c0_i32_0 : i32, i32
  }
  func.func @transform_9(%arg0: i32) -> (i32, i32) {
    %c0_i32 = arith.constant 0 : i32
    %c0_i32_0 = arith.constant 0 : i32
    return %arg0, %c0_i32 : i32, i32
  }
}

</mosaic_0001>

<bundles_post_ra>
// kernel: tpu_custom_call.1
= control target key start
LH: loop header
LB: loop body
LE: loop exit
PB: predicated region body
PF: predicated region fallthrough
CT: control target
= control target key end

     0   :  { %vm46_vm0 = vcmask 1043456   ;;  %v575_v2 = vmov 0.0   ;;  %vm576_vm1 = vmmov 0   ;;  %vm42_vm2 = vcmask 31744   ;;  %s776_s0 = inlined_call_operand.vmem [shape: f32[8,4], index: 0, kind: input, shape index: {}]   ;;  %s777_s1 = inlined_call_operand.vmem [shape: f32[4,32], index: 1, kind: input, shape index: {}]   ;;  %s778_s2 = inlined_call_operand.vmem [shape: f32[1,32], index: 2, kind: input, shape index: {}]   ;;  %s779_s3 = inlined_call_operand.vmem [shape: f32[32,64], index: 3, kind: input, shape index: {}]   ;;  %s780_s4 = inlined_call_operand.vmem [shape: f32[1,64], index: 4, kind: input, shape index: {}]   ;;  %s781_s5 = inlined_call_operand.vmem [shape: f32[64,128], index: 5, kind: input, shape index: {}]   ;;  %s782_s6 = inlined_call_operand.vmem [shape: f32[1,128], index: 6, kind: input, shape index: {}]   ;;  %s783_s7 = inlined_call_operand.vmem [shape: f32[128,102], index: 7, kind: input, shape index: {}]   ;;  %s784_s8 = inlined_call_operand.vmem [shape: f32[1,102], index: 8, kind: input, shape index: {}]   ;;  %s785_s9 = inlined_call_operand.hbm [shape: f32[8,102], index: 9, kind: output, shape index: {}]  }
   0x1   :  { %v34_v0 = vld [vmem:[%s777_s1] sm:$0xf]  ;;  %475 = vmatprep.subr.mxu0 %v575_v2  ;;  %477 = vmatprep.mubr.msk.f32.mxu0 %vm576_vm1, %v575_v2  ;;  %v124_v3 = vld [vmem:[%s779_s3 + $0x18] sm:$0xff] }
   0x2   :  { %v33_v1 = vld [vmem:[%s776_s0] sm:$0xff] }
   0x3   :  { %14 = vsyncpa [#allocation3], 0  ;;  %476 = vmatpush3.msk.msra.mxu0 %vm46_vm0, %v34_v0  ;;  %510 = vmatprep.subr.mxu1 %v575_v2  ;;  %v123_v4 = vld [vmem:[%s779_s3 + $0x10] sm:$0xff]  ;;  %v122_v5 = vld [vmem:[%s779_s3 + $0x8] sm:$0xff]  ;;  %vm132_vm3 = vcmask 261120   ;;  %vm222_vm4 = vcmask 523264   ;;  %v390_v52 = vlaneseq }
   0x4   :  { %478 = vmatmul.mubr.msk.f32.vlgmr.msra.gmra.mxu0 %vm42_vm2, %v33_v1  ;;  %480 = vmatprep.subr.mxu0 %v575_v2  ;;  %v121_v6 = vld [vmem:[%s779_s3] sm:$0xff]  ;;  %v214_v12 = vld [vmem:[%s781_s5 + $0x38] sm:$0xff]  ;;  %v213_v13 = vld [vmem:[%s781_s5 + $0x30] sm:$0xff]  ;;  %vm393_vm5 = vcmask 416768   ;;  %vm397_vm6 = vcmask 834968   ;;  %vm418_vm8 = vcmask 834560  }
   0x5   :  { %481 = vmatpush3.msra.mxu0 %v124_v3  ;;  %488 = vmatprep.mubr.msk.f32.mxu0 %vm576_vm1, %v575_v2  ;;  %v434_v7 = vld [vmem:[%s778_s2] ss:$0 sm:$0xff]  ;;  %v212_v14 = vld [vmem:[%s781_s5 + $0x28] sm:$0xff]  ;;  %v210_v16 = vld [vmem:[%s781_s5 + $0x18] sm:$0xff]  ;;  %v391_v53 = vand.u32 127, %v390_v52 }
   0x6   :  { %482 = vmatprep.subr.mxu0 %v575_v2  ;;  %542 = vmatprep.mubr.msk.f32.mxu1 %vm576_vm1, %v575_v2  ;;  %v211_v15 = vld [vmem:[%s781_s5 + $0x20] sm:$0xff]  ;;  %v209_v17 = vld [vmem:[%s781_s5 + $0x10] sm:$0xff]  ;;  %v208_v18 = vld [vmem:[%s781_s5 + $0x8] sm:$0xff] }
   0x7   :  { %483 = vmatpush3.msra.mxu0 %v123_v4  ;;  %v207_v19 = vld [vmem:[%s781_s5] sm:$0xff]  ;;  %v312_v20 = vld [vmem:[%s783_s7 + $0x78] sm:$0xff]  ;;  %v311_v21 = vld [vmem:[%s783_s7 + $0x70] sm:$0xff]  ;;  %vm392_vm7 = vcmp.lt.s32.totalorder %v391_v53, 51 }
   0x8   :  { %484 = vmatprep.subr.mxu0 %v575_v2  ;;  %511 = vmatpush3.msra.mxu1 %v312_v20  ;;  %v310_v22 = vld [vmem:[%s783_s7 + $0x68] sm:$0xff]  ;;  %v309_v23 = vld [vmem:[%s783_s7 + $0x60] sm:$0xff]  ;;  %v308_v24 = vld [vmem:[%s783_s7 + $0x58] sm:$0xff] }
   0x9   :  { %485 = vmatpush3.msra.mxu0 %v122_v5  ;;  %512 = vmatprep.subr.mxu1 %v575_v2  ;;  %v307_v25 = vld [vmem:[%s783_s7 + $0x50] sm:$0xff]  ;;  %v306_v26 = vld [vmem:[%s783_s7 + $0x48] sm:$0xff]  ;;  %v305_v27 = vld [vmem:[%s783_s7 + $0x40] sm:$0xff] }
   0xa   :  { %486 = vmatprep.subr.mxu0 %v575_v2  ;;  %513 = vmatpush3.msra.mxu1 %v311_v21  ;;  %v304_v28 = vld [vmem:[%s783_s7 + $0x38] sm:$0xff]  ;;  %v303_v29 = vld [vmem:[%s783_s7 + $0x30] sm:$0xff]  ;;  %v302_v30 = vld [vmem:[%s783_s7 + $0x28] sm:$0xff] }
   0xb   :  { %487 = vmatpush3.msra.mxu0 %v121_v6  ;;  %514 = vmatprep.subr.mxu1 %v575_v2  ;;  %v301_v31 = vld [vmem:[%s783_s7 + $0x20] sm:$0xff]  ;;  %v300_v32 = vld [vmem:[%s783_s7 + $0x18] sm:$0xff]  ;;  %v299_v38 = vld [vmem:[%s783_s7 + $0x10] sm:$0xff] }
   0xc   :  { %491 = vmatprep.subr.mxu0 %v575_v2  ;;  %515 = vmatpush3.msra.mxu1 %v310_v22  ;;  %v437_v33 = vld [vmem:[%s780_s4] ss:$0 sm:$0xff]  ;;  %v298_v39 = vld [vmem:[%s783_s7 + $0x8] sm:$0xff] }
   0xd   :  { %516 = vmatprep.subr.mxu1 %v575_v2  ;;  %v297_v40 = vld [vmem:[%s783_s7] sm:$0xff]  ;;  %s578_s7 = smov [#allocation2]  }
   0xe   :  { %517 = vmatpush3.msra.mxu1 %v309_v23  ;;  %v439_v41 = vld [vmem:[%s782_s6] ss:$0 sm:$0xff]  ;;  %s577_s6 = smov 77  }
   0xf   :  { %518 = vmatprep.subr.mxu1 %v575_v2  ;;  %v441_v46 = vld [vmem:[%s784_s8] ss:$0 sm:$0xff]  ;;  %s426_s8 = sshll.u32 %s578_s7, 4  ;;  %s427_s8 = int_to_ptr.vmem [resolvable:$true] %s426_s8 }
  0x10   :  { %519 = vmatpush3.msra.mxu1 %v308_v24  ;;  %s553_s22 = scalar_lea.vmem %s427_s8, 128  ;;  %p558_p1 = scmp.lt.s32.totalorder %s427_s8, %s427_s8 }
  0x11   :  { %520 = vmatprep.subr.mxu1 %v575_v2  ;;  %p554_p0 = scmp.ne.s32.totalorder %s427_s8, %s553_s22  ;;  %p559_p2 = scmp.lt.s32.totalorder %s553_s22, %s553_s22 }
  0x12   :  { %521 = vmatpush3.msra.mxu1 %v307_v25 }
  0x13   :  { %522 = vmatprep.subr.mxu1 %v575_v2  ;;  %p560_p3 = por %p559_p2, %p558_p1 }
  0x14   :  { %523 = vmatpush3.msra.mxu1 %v306_v26 }
  0x15   :  { %524 = vmatprep.subr.mxu1 %v575_v2  ;;  %p561_p4 = pnand %p560_p3, %p554_p0 }
  0x16   :  { %525 = vmatpush3.msra.mxu1 %v305_v27 }
  0x17   :  { %526 = vmatprep.subr.mxu1 %v575_v2 }
  0x18   :  { %527 = vmatpush3.msra.mxu1 %v304_v28 }
  0x19   :  { %528 = vmatprep.subr.mxu1 %v575_v2 }
  0x1a   :  { %529 = vmatpush3.msra.mxu1 %v303_v29 }
  0x1b   :  { %530 = vmatprep.subr.mxu1 %v575_v2 }
  0x1c   :  { %531 = vmatpush3.msra.mxu1 %v302_v30 }
  0x1d   :  { %532 = vmatprep.subr.mxu1 %v575_v2 }
  0x1e   :  { %533 = vmatpush3.msra.mxu1 %v301_v31 }
  0x1f   :  { %534 = vmatprep.subr.mxu1 %v575_v2 }
  0x20   :  { %535 = vmatpush3.msra.mxu1 %v300_v32 }
  0x21   :  { %536 = vmatprep.subr.mxu1 %v575_v2 }
  0x22   :  { %537 = vmatpush3.msra.mxu1 %v299_v38 }
  0x23   :  { %538 = vmatprep.subr.mxu1 %v575_v2 }
  0x24   :  { %539 = vmatpush3.msra.mxu1 %v298_v39 }
  0x25   :  { %540 = vmatprep.subr.mxu1 %v575_v2 }
  0x26   :  { %541 = vmatpush3.msra.mxu1 %v297_v40 }
  0xc4   :  { %v116_v8 = vpop.f32.mrf.mxu0 }
  0xc5   :  { %v117_v9 = vadd.f32 %v434_v7, %v116_v8 }
  0xc6   :  { %v479_v10 = vpop.f32.mrf.mxu0 }
  0xc7   :  { %v120_v11 = vmax.f32 %v117_v9, 0.0 }
  0xc9   :  { %489 = vmatmul.mubr.msk.f32.vlgmr.msra.gmra.mxu0 %vm132_vm3, %v120_v11 }
  0xca   :  { %492 = vmatpush3.msra.mxu0 %v214_v12  ;;  %507 = vmatprep.mubr.msk.f32.mxu0 %vm576_vm1, %v575_v2 }
  0xcb   :  { %493 = vmatprep.subr.mxu0 %v575_v2 }
  0xcc   :  { %494 = vmatpush3.msra.mxu0 %v213_v13 }
  0xcd   :  { %495 = vmatprep.subr.mxu0 %v575_v2 }
  0xce   :  { %496 = vmatpush3.msra.mxu0 %v212_v14 }
  0xcf   :  { %497 = vmatprep.subr.mxu0 %v575_v2 }
  0xd0   :  { %498 = vmatpush3.msra.mxu0 %v211_v15 }
  0xd1   :  { %499 = vmatprep.subr.mxu0 %v575_v2 }
  0xd2   :  { %500 = vmatpush3.msra.mxu0 %v210_v16 }
  0xd3   :  { %501 = vmatprep.subr.mxu0 %v575_v2 }
  0xd4   :  { %502 = vmatpush3.msra.mxu0 %v209_v17 }
  0xd5   :  { %503 = vmatprep.subr.mxu0 %v575_v2 }
  0xd6   :  { %504 = vmatpush3.msra.mxu0 %v208_v18 }
  0xd7   :  { %505 = vmatprep.subr.mxu0 %v575_v2 }
  0xd8   :  { %506 = vmatpush3.msra.mxu0 %v207_v19 }
 0x189   :  { %v202_v34 = vpop.f32.mrf.mxu0 }
 0x18a   :  { %v203_v35 = vadd.f32 %v437_v33, %v202_v34 }
 0x18b   :  { %v490_v36 = vpop.f32.mrf.mxu0 }
 0x18c   :  { %v206_v37 = vmax.f32 %v203_v35, 0.0 }
 0x18e   :  { %508 = vmatmul.mubr.msk.f32.vlgmr.msra.gmra.mxu0 %vm222_vm4, %v206_v37 }
 0x24e   :  { %v292_v42 = vpop.f32.mrf.mxu0 }
 0x24f   :  { %v293_v43 = vadd.f32 %v439_v41, %v292_v42 }
 0x250   :  { %v509_v44 = vpop.f32.mrf.mxu0 }
 0x251   :  { %v296_v45 = vmax.f32 %v293_v43, 0.0 }
 0x253   :  { %543 = vmatmul.mubr.f32.vlgmr.msra.gmra.mxu1 %v296_v45 }
 0x313   :  { %v386_v47 = vpop.f32.mrf.mxu1 }
 0x314   :  { %v387_v48 = vadd.f32 %v441_v46, %v386_v47 }
 0x315   :  { %v544_v49 = vpop.f32.mrf.mxu1 }
 0x316   :  { %v394_v50 = vsel %vm393_vm5, %v387_v48, -inf  ;;  %v398_v51 = vsel %vm397_vm6, %v387_v48, -inf }
 0x317   :  { %395 = vmax.xlane.f32.xlu0 %v394_v50 }
 0x31b   :  { %399 = vmax.xlane.f32.xlu0 %v398_v51 }
 0x3a0   :  { %v396_v54 = vpop.xlane.xlu0 %395 }
 0x3a4   :  { %v400_v55 = vpop.xlane.xlu0 %399 }
 0x3a5   :  { %v401_v56 = vsel %vm392_vm7, %v396_v54, %v400_v55 }
 0x3a6   :  { %v402_v57 = vsub.f32 %v387_v48, %v401_v56 }
 0x3a8   :  { %v403_v58 = vmul.f32 1.442695, %v402_v57 }
 0x3aa   :  { %549 = vpow2.f32 %v403_v58 }
 0x3b7   :  { %v550_v59 = vpop.eup %549 }
 0x3b8   :  { %409 = vrot.lane.b32.xlu1 %v550_v59, %s577_s6  ;;  %v405_v60 = vsel %vm393_vm5, %v550_v59, 0.0 }
 0x3dc   :  { %406 = vadd.xlane.f32.xlu1 %v405_v60 }
 0x42a   :  { %v410_v61 = vpop.permute.xlu1 %409 }
 0x42b   :  { %v412_v62 = vsel %vm393_vm5, %v410_v61, 0.0 }
 0x42c   :  { %413 = vadd.xlane.f32.xlu0 %v412_v62 }
 0x465   :  { %v407_v63 = vpop.xlane.xlu1 %406 }
 0x4b5   :  { %v414_v0 = vpop.xlane.xlu0 %413 }
 0x4b6   :  { %v415_v1 = vsel %vm392_vm7, %v407_v63, %v414_v0 }
 0x4b7   :  { %551 = vrcp.f32 %v415_v1 }
 0x4c4   :  { %v552_v2 = vpop.eup %551 }
 0x4c5   :  { %v417_v3 = vmul.f32 %v552_v2, %v550_v59 }
 0x4c7   :  { %419 = vst.msk [vmem:[#allocation2] sm:$0xff] %vm418_vm8, %v417_v3 }
 0x4c8   :  { %564 = shalt.err (!%p561_p4)
}
 0x4c9   :  { %429 = dma.vmem_to_hbm [thread:$0]  %s427_s8, 128, %s785_s9, [#allocation3]  }
 0x4ca   :  { %573 = dma.done.wait [#allocation3], 128  }
 0x4cb   :  { %574 = vsyncadd [#allocation3], 4294967168 }
 0x4cc   :  { %433 = vsyncpa [#allocation3], 1 }

</bundles_post_ra>
